<compile_context>
chip_gen: v5e
topology: v5e:2x2
jax: 0.10.0
libtpu: 0.0.40
codegen_flags: <defaults>
</compile_context>

<pallas_src>
import functools
import math

import jax
import jax.numpy as jnp
import numpy as np
from jax import lax
from jax.experimental import pallas as pl
from jax.experimental.pallas import tpu as pltpu


# ------------------------------- Pallas kernel --------------------------------
def _coordconv1x1_kernel(x_ref, coords_ref, wf_ref, waux_ref, o_ref, *,
                         b_tile, use_vpu_contraction):
    """One (spatial-tile, batch-tile) step of the 1x1 CoordConv.

    x_ref     : (b_tile, C, tile_hw)  channel-major activation tile
    coords_ref: (2, tile_hw)          row 0 = xx(h), row 1 = yy(w)   (f32)
    wf_ref    : (N, C)                feature part of the 1x1 weight
    waux_ref  : (N, 3)                [w_xx, w_yy, bias]             (f32)
    o_ref     : (b_tile, N, tile_hw)  lane-dense output tile
    """
    # Coordinate + bias contribution, shared by every batch element of the tile.
    xx = coords_ref[0:1, :]                                   # (1, tile_hw) f32
    yy = coords_ref[1:2, :]
    waux = waux_ref[...]                                      # (N, 3) f32
    coord = waux[:, 0:1] * xx + waux[:, 1:2] * yy + waux[:, 2:3]   # (N, tile_hw)

    wf = wf_ref[...]                                          # (N, C)

    def compute_one(b):
        xb = x_ref[b]                                         # (C, tile_hw)
        if use_vpu_contraction:
            # Tiny contraction: unrolled VPU multiply-adds hide under the
            # streaming DMA and avoid MXU push/pop latency entirely.
            wf32 = wf.astype(jnp.float32)
            xb32 = xb.astype(jnp.float32)
            acc = coord
            for c in range(wf.shape[1]):
                acc = acc + wf32[:, c:c + 1] * xb32[c:c + 1, :]
        else:
            acc = jnp.dot(wf, xb, preferred_element_type=jnp.float32) + coord
        o_ref[b] = acc.astype(o_ref.dtype)

    if b_tile <= 8:
        for b in range(b_tile):                               # static unroll
            compute_one(b)
    else:
        def body(b, carry):
            compute_one(b)
            return carry
        lax.fori_loop(0, b_tile, body, 0)


# ------------------------------- tiling helpers --------------------------------
def _vmem_limit_bytes():
    """Generation-aware scoped-VMEM request (v5e/v6e: 128 MiB phys, v7x: 64 MiB/TC)."""
    cap = 64 << 20                      # conservative default = v7x per-TC physical
    try:
        cap = int(getattr(pltpu.get_tpu_info(), "vmem_capacity_bytes", cap))
    except Exception:
        pass
    return int(min(cap // 2, 48 << 20))


def _pick_spatial_tile(hw, cap_lanes):
    """Largest lane tile: full H*W if it fits, else a 128-multiple (divisor preferred)."""
    if hw <= cap_lanes:
        return hw
    cap = max(128, (cap_lanes // 128) * 128)
    for t in range(cap, 127, -128):     # prefer a divisor -> no padded last block
        if hw % t == 0:
            return t
    return cap                          # padded last block; OOB lanes are dropped


def _choose_tiling(B, C, N, HW, itemsize, vmem_limit, target_step_bytes=4 << 20):
    """Pick (tile_hw, b_tile) so each grid step streams ~target bytes (in + out)
    while the double-buffered working set stays well inside the scoped VMEM."""
    per_lane = (C + N) * itemsize                      # in + out bytes per position
    target_lanes = max(128, target_step_bytes // per_lane)
    vmem_lanes = max(128, (vmem_limit * 3 // 8) // per_lane)   # 2x buffers <= 75%
    cap_lanes = min(target_lanes, vmem_lanes)

    tile_hw = _pick_spatial_tile(HW, cap_lanes)
    if tile_hw == HW:
        b_tile = int(max(1, min(B, cap_lanes // max(1, HW))))  # batch blocking
    else:
        b_tile = 1

    num_hw = pl.cdiv(HW, tile_hw)
    num_b = pl.cdiv(B, b_tile)

    # v7x megacore: keep >= 2 grid steps whenever possible so both TCs get work.
    if num_hw * num_b == 1:
        if B >= 2:
            b_tile = pl.cdiv(B, 2)
        elif HW >= 256:
            tile_hw = _pick_spatial_tile(HW, max(128, ((HW // 2) // 128) * 128))
        num_hw = pl.cdiv(HW, tile_hw)
        num_b = pl.cdiv(B, b_tile)
    return int(tile_hw), int(b_tile), int(num_hw), int(num_b)


# --------------------------------- wrapper -------------------------------------
def coordconv1x1(x_nchw, weight, bias):
    """CoordConv2d(in_dim, out_dim, kernel_size=1) forward.

    x_nchw: (B, C, H, W).  weight: (out_dim, C+2) -- 1x1 kernel squeezed, the last
    two input channels multiply the xx / yy coordinate channels.  bias: (out_dim,).
    Returns (B, out_dim, H, W) in x_nchw.dtype.
    """
    B, C, H, W = x_nchw.shape
    N = weight.shape[0]
    HW = H * W
    itemsize = jnp.dtype(x_nchw.dtype).itemsize

    vmem_limit = _vmem_limit_bytes()
    tile_hw, b_tile, num_hw, num_b = _choose_tiling(B, C, N, HW, itemsize, vmem_limit)

    # Channel-major matmul; (B,C,H,W)->(B,C,H*W) is a free reshape (no transpose).
    x_flat = x_nchw.reshape(B, C, HW)

    # Tiny batch-independent coordinate map (2*HW*4 bytes): removes all iota /
    # integer div-mod from the kernel.  xx varies along H, yy along W.
    hh = jnp.arange(H, dtype=jnp.float32) * (2.0 / max(H - 1, 1)) - 1.0
    ww = jnp.arange(W, dtype=jnp.float32) * (2.0 / max(W - 1, 1)) - 1.0
    coords = jnp.stack([
        jnp.broadcast_to(hh[:, None], (H, W)).reshape(HW),
        jnp.broadcast_to(ww[None, :], (H, W)).reshape(HW),
    ], axis=0)                                          # (2, HW) f32

    w_feat = weight[:, :C].astype(x_nchw.dtype)         # (N, C) feature weights
    w_aux = jnp.concatenate(                            # (N, 3) [w_xx, w_yy, bias] f32
        [weight[:, C:C + 2].astype(jnp.float32),
         bias.astype(jnp.float32)[:, None]], axis=1)

    use_vpu = (C <= 8) and (N <= 16)                    # tiny contraction -> skip MXU
    kernel = functools.partial(_coordconv1x1_kernel, b_tile=b_tile,
                               use_vpu_contraction=use_vpu)

    cost = pl.CostEstimate(
        flops=2 * B * N * (C + 2) * HW,
        transcendentals=0,
        bytes_accessed=itemsize * B * HW * (C + N) + 8 * HW + 4 * N * (C + 3),
    )

    # Grid order (spatial outer, batch inner): coords / weight blocks keep the same
    # block index across the inner batch axis, so they are not re-fetched.
    # NOTE: pipeline_mode=pl.Buffered(3) on the x/out specs is a further knob if a
    # trace still shows exposed DMA; left at the default double-buffering here.
    out_flat = pl.pallas_call(
        kernel,
        out_shape=jax.ShapeDtypeStruct((B, N, HW), x_nchw.dtype),
        grid=(num_hw, num_b),
        in_specs=[
            pl.BlockSpec((b_tile, C, tile_hw), lambda j, bi: (bi, 0, j)),  # x
            pl.BlockSpec((2, tile_hw), lambda j, bi: (0, j)),              # coords
            pl.BlockSpec((N, C), lambda j, bi: (0, 0)),                    # w_feat
            pl.BlockSpec((N, 3), lambda j, bi: (0, 0)),                    # w_aux
        ],
        out_specs=pl.BlockSpec((b_tile, N, tile_hw), lambda j, bi: (bi, 0, j)),
        compiler_params=pltpu.CompilerParams(
            dimension_semantics=("parallel", "parallel"),
            vmem_limit_bytes=vmem_limit,
        ),
        cost_estimate=cost,
    )(x_flat, coords, w_feat, w_aux)
    return out_flat.reshape(B, N, H, W)                 # free reshape back to NCHW


def descriptor_forward(x_nchw, weight, bias):
    """Descriptor.forward: a single CoordConv2d(in_dim, out_dim, 1)."""
    return coordconv1x1(x_nchw, weight, bias)


# --------------------------- reference / init helpers ---------------------------
def add_coords_nchw(x):
    """Reference AddCoords (with_r=False): xx varies along H, yy along W."""
    B, C, H, W = x.shape
    hh = (jnp.arange(H, dtype=jnp.float32) / max(H - 1, 1)) * 2.0 - 1.0
    ww = (jnp.arange(W, dtype=jnp.float32) / max(W - 1, 1)) * 2.0 - 1.0
    xx_ch = jnp.broadcast_to(hh[None, None, :, None], (B, 1, H, W)).astype(x.dtype)
    yy_ch = jnp.broadcast_to(ww[None, None, None, :], (B, 1, H, W)).astype(x.dtype)
    return jnp.concatenate([x, xx_ch, yy_ch], axis=1)


def init_coordconv_params(key, in_dim, out_dim, dtype=jnp.float32):
    """Deterministic init mimicking nn.Conv2d defaults (kaiming-uniform, a=sqrt(5))."""
    in_size = in_dim + 2                       # +2 coordinate channels (with_r=False)
    bound = 1.0 / math.sqrt(in_size)           # fan_in = in_size * 1 * 1
    kw, kb = jax.random.split(key)
    weight = jax.random.uniform(kw, (out_dim, in_size), dtype, -bound, bound)
    bias = jax.random.uniform(kb, (out_dim,), dtype, -bound, bound)
    return weight, bias


# ----------------------------------- main ---------------------------------------
if __name__ == "__main__":
    B, in_dim, out_dim, H, W = 2, 4, 8, 16, 16

    key = jax.random.PRNGKey(0)
    kx, kp = jax.random.split(key)
    x = jax.random.normal(kx, (B, in_dim, H, W), jnp.float32)
    weight, bias = init_coordconv_params(kp, in_dim, out_dim)

    out = jax.block_until_ready(descriptor_forward(x, weight, bias))
    assert out.shape == (B, out_dim, H, W), out.shape

    # Pure-JAX reference (materialized coordinate channels).
    x_aug = add_coords_nchw(x)
    ref = jnp.einsum("bkhw,ok->bohw", x_aug, weight) + bias[None, :, None, None]
    np.testing.assert_allclose(np.asarray(out), np.asarray(ref), rtol=1e-5, atol=1e-5)

    # bf16 streaming path (mem-bound kernel -> ~2x less HBM traffic on v6e/v7x).
    x_bf = x.astype(jnp.bfloat16)
    w_bf = weight.astype(jnp.bfloat16)
    b_bf = bias.astype(jnp.bfloat16)
    out_bf = jax.block_until_ready(descriptor_forward(x_bf, w_bf, b_bf))
    assert out_bf.shape == (B, out_dim, H, W) and out_bf.dtype == jnp.bfloat16
    ref_bf = (jnp.einsum("bkhw,ok->bohw",
                         add_coords_nchw(x_bf).astype(jnp.float32),
                         w_bf.astype(jnp.float32))
              + b_bf.astype(jnp.float32)[None, :, None, None])
    np.testing.assert_allclose(np.asarray(out_bf, dtype=np.float32),
                               np.asarray(ref_bf), rtol=0.05, atol=0.05)

    print("KERNEL_OK")
</pallas_src>

<mosaic_0001>
module attributes {stable_mosaic.version = 11 : i64} {
  func.func @_coordconv1x1_kernel(%arg0: i32, %arg1: i32, %arg2: memref<1x4x256xf32, #tpu.memory_space<vmem>>, %arg3: memref<2x256xf32, #tpu.memory_space<vmem>>, %arg4: memref<8x4xf32, #tpu.memory_space<vmem>>, %arg5: memref<8x3xf32, #tpu.memory_space<vmem>>, %arg6: memref<1x8x256xf32, #tpu.memory_space<vmem>>) attributes {dimension_semantics = [#tpu.dimension_semantics<parallel>, #tpu.dimension_semantics<parallel>], iteration_bounds = array<i64: 1, 2>, scalar_prefetch = 0 : i64, scratch_operands = 0 : i64, tpu.core_type = #tpu.core_type<tc>, window_params = [{transform_indices = @transform_0, window_bounds = array<i64: 1, 4, 256>}, {transform_indices = @transform_1, window_bounds = array<i64: 2, 256>}, {pipeline_mode = #tpu.pipeline_mode<synchronous>, transform_indices = @transform_2, window_bounds = array<i64: 8, 4>}, {pipeline_mode = #tpu.pipeline_mode<synchronous>, transform_indices = @transform_3, window_bounds = array<i64: 8, 3>}, {transform_indices = @transform_4, window_bounds = array<i64: 1, 8, 256>}]} {
    %c0 = arith.constant 0 : index
    %c0_0 = arith.constant 0 : index
    %0 = vector.load %arg3[%c0, %c0_0] : memref<2x256xf32, #tpu.memory_space<vmem>>, vector<1x256xf32>
    %c1 = arith.constant 1 : index
    %c0_1 = arith.constant 0 : index
    %1 = vector.load %arg3[%c1, %c0_1] : memref<2x256xf32, #tpu.memory_space<vmem>>, vector<1x256xf32>
    %c0_2 = arith.constant 0 : index
    %c0_3 = arith.constant 0 : index
    %2 = vector.load %arg5[%c0_2, %c0_3] : memref<8x3xf32, #tpu.memory_space<vmem>>, vector<8x3xf32>
    %3 = vector.extract_strided_slice %2 {offsets = [0, 0], sizes = [8, 1], strides = [1, 1]} : vector<8x3xf32> to vector<8x1xf32>
    %4 = vector.broadcast %3 : vector<8x1xf32> to vector<8x256xf32>
    %5 = vector.broadcast %0 : vector<1x256xf32> to vector<8x256xf32>
    %6 = arith.mulf %4, %5 : vector<8x256xf32>
    %7 = vector.extract_strided_slice %2 {offsets = [0, 1], sizes = [8, 1], strides = [1, 1]} : vector<8x3xf32> to vector<8x1xf32>
    %8 = vector.broadcast %7 : vector<8x1xf32> to vector<8x256xf32>
    %9 = vector.broadcast %1 : vector<1x256xf32> to vector<8x256xf32>
    %10 = arith.mulf %8, %9 : vector<8x256xf32>
    %11 = arith.addf %6, %10 : vector<8x256xf32>
    %12 = vector.extract_strided_slice %2 {offsets = [0, 2], sizes = [8, 1], strides = [1, 1]} : vector<8x3xf32> to vector<8x1xf32>
    %13 = vector.broadcast %12 : vector<8x1xf32> to vector<8x256xf32>
    %14 = arith.addf %11, %13 : vector<8x256xf32>
    %c0_4 = arith.constant 0 : index
    %c0_5 = arith.constant 0 : index
    %15 = vector.load %arg4[%c0_4, %c0_5] : memref<8x4xf32, #tpu.memory_space<vmem>>, vector<8x4xf32>
    %c0_6 = arith.constant 0 : index
    %c0_7 = arith.constant 0 : index
    %c0_8 = arith.constant 0 : index
    %16 = vector.load %arg2[%c0_6, %c0_7, %c0_8] : memref<1x4x256xf32, #tpu.memory_space<vmem>>, vector<1x4x256xf32>
    %17 = vector.shape_cast %16 : vector<1x4x256xf32> to vector<4x256xf32>
    %18 = vector.extract_strided_slice %15 {offsets = [0, 0], sizes = [8, 1], strides = [1, 1]} : vector<8x4xf32> to vector<8x1xf32>
    %19 = vector.extract_strided_slice %17 {offsets = [0, 0], sizes = [1, 256], strides = [1, 1]} : vector<4x256xf32> to vector<1x256xf32>
    %20 = vector.broadcast %18 : vector<8x1xf32> to vector<8x256xf32>
    %21 = vector.broadcast %19 : vector<1x256xf32> to vector<8x256xf32>
    %22 = arith.mulf %20, %21 : vector<8x256xf32>
    %23 = arith.addf %14, %22 : vector<8x256xf32>
    %24 = vector.extract_strided_slice %15 {offsets = [0, 1], sizes = [8, 1], strides = [1, 1]} : vector<8x4xf32> to vector<8x1xf32>
    %25 = vector.extract_strided_slice %17 {offsets = [1, 0], sizes = [1, 256], strides = [1, 1]} : vector<4x256xf32> to vector<1x256xf32>
    %26 = vector.broadcast %24 : vector<8x1xf32> to vector<8x256xf32>
    %27 = vector.broadcast %25 : vector<1x256xf32> to vector<8x256xf32>
    %28 = arith.mulf %26, %27 : vector<8x256xf32>
    %29 = arith.addf %23, %28 : vector<8x256xf32>
    %30 = vector.extract_strided_slice %15 {offsets = [0, 2], sizes = [8, 1], strides = [1, 1]} : vector<8x4xf32> to vector<8x1xf32>
    %31 = vector.extract_strided_slice %17 {offsets = [2, 0], sizes = [1, 256], strides = [1, 1]} : vector<4x256xf32> to vector<1x256xf32>
    %32 = vector.broadcast %30 : vector<8x1xf32> to vector<8x256xf32>
    %33 = vector.broadcast %31 : vector<1x256xf32> to vector<8x256xf32>
    %34 = arith.mulf %32, %33 : vector<8x256xf32>
    %35 = arith.addf %29, %34 : vector<8x256xf32>
    %36 = vector.extract_strided_slice %15 {offsets = [0, 3], sizes = [8, 1], strides = [1, 1]} : vector<8x4xf32> to vector<8x1xf32>
    %37 = vector.extract_strided_slice %17 {offsets = [3, 0], sizes = [1, 256], strides = [1, 1]} : vector<4x256xf32> to vector<1x256xf32>
    %38 = vector.broadcast %36 : vector<8x1xf32> to vector<8x256xf32>
    %39 = vector.broadcast %37 : vector<1x256xf32> to vector<8x256xf32>
    %40 = arith.mulf %38, %39 : vector<8x256xf32>
    %41 = arith.addf %35, %40 : vector<8x256xf32>
    %c0_9 = arith.constant 0 : index
    %c0_10 = arith.constant 0 : index
    %c0_11 = arith.constant 0 : index
    %42 = vector.load %arg6[%c0_9, %c0_10, %c0_11] : memref<1x8x256xf32, #tpu.memory_space<vmem>>, vector<1x8x256xf32>
    %43 = vector.shape_cast %42 : vector<1x8x256xf32> to vector<8x256xf32>
    %44 = vector.shape_cast %41 : vector<8x256xf32> to vector<1x8x256xf32>
    tpu.vector_store %arg6[%c0_9, %c0_10, %c0_11], %44 {strides = array<i32>} : memref<1x8x256xf32, #tpu.memory_space<vmem>>, vector<1x8x256xf32>,
    return
  }
  func.func @transform_0(%arg0: i32, %arg1: i32) -> (i32, i32, i32) {
    %c0_i32 = arith.constant 0 : i32
    %c0_i32_0 = arith.constant 0 : i32
    return %arg1, %c0_i32, %arg0 : i32, i32, i32
  }
  func.func @transform_1(%arg0: i32, %arg1: i32) -> (i32, i32) {
    %c0_i32 = arith.constant 0 : i32
    %c0_i32_0 = arith.constant 0 : i32
    return %c0_i32, %arg0 : i32, i32
  }
  func.func @transform_2(%arg0: i32, %arg1: i32) -> (i32, i32) {
    %c0_i32 = arith.constant 0 : i32
    %c0_i32_0 = arith.constant 0 : i32
    %c0_i32_1 = arith.constant 0 : i32
    return %c0_i32, %c0_i32_0 : i32, i32
  }
  func.func @transform_3(%arg0: i32, %arg1: i32) -> (i32, i32) {
    %c0_i32 = arith.constant 0 : i32
    %c0_i32_0 = arith.constant 0 : i32
    %c0_i32_1 = arith.constant 0 : i32
    return %c0_i32, %c0_i32_0 : i32, i32
  }
  func.func @transform_4(%arg0: i32, %arg1: i32) -> (i32, i32, i32) {
    %c0_i32 = arith.constant 0 : i32
    %c0_i32_0 = arith.constant 0 : i32
    return %arg1, %c0_i32, %arg0 : i32, i32, i32
  }
}

</mosaic_0001>

<bundles_post_ra>
// kernel: tpu_custom_call.1
= control target key start
LH: loop header
LB: loop body
LE: loop exit
PB: predicated region body
PF: predicated region fallthrough
CT: control target
= control target key end

     0   :  { %9 = vsyncpa [#allocation3], 0  ;;  %s762_s0 = inlined_call_operand.vmem [shape: f32[2,4,256], index: 0, kind: input, shape index: {}]   ;;  %s763_s1 = inlined_call_operand.vmem [shape: f32[2,256], index: 1, kind: input, shape index: {}]   ;;  %s764_s2 = inlined_call_operand.vmem [shape: f32[8,4], index: 2, kind: input, shape index: {}]   ;;  %s765_s3 = inlined_call_operand.vmem [shape: f32[8,3], index: 3, kind: input, shape index: {}]   ;;  %s766_s4 = inlined_call_operand.hbm [shape: f32[2,8,256], index: 4, kind: output, shape index: {}]  }
   0x1   :  { %11 = vsyncpa [#allocation3 + $0x1], 0  ;;  %s649_s15 = smov 0   ;;  %s651_s16 = smov 0  }
   0x2   :  { %s653_s17 = smov 0   ;;  %s655_s18 = smov 0  }
   0x3   :  { %s657_s19 = smov 0   ;;  %s659_s20 = smov 0  }
   0x4 LB: > { %s456_s21 = sadd.s32 4294967295, %s618_s20   ;;  %s457_s22 = sadd.s32 4294967294, %s618_s20   ;;  %s618_s20 = sphi %s659_s20, %s17_s20   ;;  %s614_s19 = sphi %s657_s19, %s773_s19   ;;  %s610_s18 = sphi %s655_s18, %s772_s18   ;;  %s606_s17 = sphi %s653_s17, %s771_s17   ;;  %s602_s16 = sphi %s651_s16, %s770_s16   ;;  %s598_s15 = sphi %s649_s15, %s769_s15  }
   0x5   : > { %s26_s23 = sadd.s32 1, %s614_s19  ;;  %s134_s24 = sadd.s32 1, %s606_s17 }
   0x6   : > { %p27_p0 = scmp.ge.s32.totalorder %s26_s23, 2  ;;  %p144_p1 = scmp.ne.s32.totalorder %s606_s17, %s602_s16 }
   0x7   : > { %p145_p2 = scmp.eq.s32.totalorder %s456_s21, 1  ;;  %p150_p3 = scmp.ne.s32.totalorder %s602_s16, %s598_s15 }
   0x8   : > { %s775_s23 = smov (%p27_p0, %s26_s23), 0  ;;  %p151_p5 = scmp.eq.s32.totalorder %s457_s22, 1 }
   0x9   : > { %p689_p4 = por %p145_p2, %p144_p1  ;;  %s129_s26 = ssub.s32 %s614_s19, %s775_s23 }
   0xa   : > { %p461_p6 = scmp.ge.s32.totalorder %s618_s20, 1  ;;  %p132_p7 = scmp.eq.s32.totalorder %s129_s26, 0 }
   0xb   : > { %p696_p8 = por %p151_p5, %p150_p3  ;;  %p197_p9 = scmp.lt.s32.totalorder %s618_s20, 3 }
   0xc   : > { %s702_s28 = scalar_select %p132_p7, %s606_s17, %s134_s24  }
   0xd   : > { %p198_p10 = pnand %p461_p6, %p197_p9 }
   0xe   : > { %p233_p11 = scmp.lt.s32.totalorder (!%p198_p10), %s610_s18, 1  ;;  %s229_s22 = sand.u32 (!%p198_p10), 1, %s602_s16  }
   0xf   : > { %201 = sbr.rel (%p198_p10) target bundleno = 164 (0xa4), region = 36  ;;  %s462_s24 = sshll.u32 (!%p198_p10), %s229_s22, 4 }
  0x10   : > { %s472_s26 = sshll.u32 (!%p198_p10), %s610_s18, 4  ;;  %s560_s13 = scalar_lea.hbm (!%p198_p10), %s766_s4, 32 }
  0x11   : > { %s360_s5 = scalar_lea.hbm (!%p198_p10), %s766_s4, %s472_s26 }
  0x14   : > { %v252_v0 = vld [vmem:[%s765_s3] sm:$0xff]  ;;  %v620_v1 = vmov 0   ;;  %v621_v2 = vmov 2   ;;  %v622_v4 = vmov 1   ;;  %v623_v5 = vmov 3   ;;  %s234_s7 = scalar_select %p233_p11, %s610_s18, 1 }
  0x15   : > { %532 = vset.pattern.permute.xlu0 %v620_v1  ;;  %534 = vset.pattern.permute.xlu1 %v621_v2  ;;  %v284_v3 = vld [vmem:[%s764_s2] sm:$0xff]  ;;  %s231_s18 = scalar_lea.vmem [#allocation2], %s462_s24 }
  0x16   : > { %255 = vperm.xlu0 %532, %v252_v0   ;;  %279 = vperm.xlu1 %534, %v252_v0   ;;  %s471_s8 = sshll.u32 %s234_s7, 3  ;;  %v249_v8 = vld [vmem:[%s763_s1] ss:$2 sm:$0x3]  ;;  %s362_s6 = sshll.u32 %s231_s18, 4  ;;  %s363_s6 = int_to_ptr.vmem [resolvable:$true] %s362_s6 }
  0x17   : > { %536 = vset.pattern.permute.xlu2 %v622_v4  ;;  %s240_s11 = scalar_lea.vmem %s762_s0, %s471_s8  ;;  %v465_v10 = vld [vmem:[%s763_s1 + $0x1] ss:$2 sm:$0x3]  ;;  %v259_v14 = vperm.slane %v249_v8, 0  ;;  %v260_v15 = vperm.slane %v249_v8, 1  ;;  %s364_s7 = sshll.u32 %s360_s5, 4  ;;  %s365_s7 = int_to_ptr.hbm [resolvable:$true] %s364_s7 }
  0x18   : > { %303 = vperm.xlu2 %536, %v284_v3   ;;  %v285_v11 = vld [vmem:[%s240_s11] sm:$0xff]  ;;  %v270_v16 = vperm.slane %v465_v10, 0  ;;  %v271_v17 = vperm.slane %v465_v10, 1  ;;  %s347_s8 = scalar_lea.sflag [#allocation3], %s229_s22  ;;  %s554_s9 = sshra.s32 %s365_s7, 4  ;;  %s555_s9 = int_to_ptr.hbm [resolvable:$true] %s554_s9 }
  0x19   : > { %v292_v12 = vperm.slane %v285_v11, 0  ;;  %v293_v13 = vperm.slane %v285_v11, 4  ;;  %v306_v18 = vperm.slane %v285_v11, 1  ;;  %v307_v19 = vperm.slane %v285_v11, 5  ;;  %s556_s10 = scalar_lea.hbm %s555_s9, 16  ;;  %p561_p1 = scmp.lt.s32.totalorder %s555_s9, %s766_s4 }
  0x1a   : > { %v320_v20 = vperm.slane %v285_v11, 2  ;;  %v321_v21 = vperm.slane %v285_v11, 6  ;;  %v334_v32 = vperm.slane %v285_v11, 3  ;;  %v335_v33 = vperm.slane %v285_v11, 7  ;;  %p557_p12 = scmp.ne.s32.totalorder %s555_s9, %s556_s10  ;;  %p562_p2 = scmp.lt.s32.totalorder %s560_s13, %s556_s10 }
  0x1b   : > { %v296_v24 = vperm.slane %v292_v12, 0  ;;  %v297_v25 = vperm.slane %v293_v13, 0  ;;  %v310_v30 = vperm.slane %v306_v18, 1  ;;  %v311_v31 = vperm.slane %v307_v19, 1 }
  0x1c   : > { %v324_v36 = vperm.slane %v320_v20, 2  ;;  %v325_v37 = vperm.slane %v321_v21, 2  ;;  %v338_v45 = vperm.slane %v334_v32, 3  ;;  %v339_v46 = vperm.slane %v335_v33, 3  ;;  %p558_p13 = pnand %p557_p12, %p689_p4  ;;  %p563_p3 = por %p562_p2, %p561_p1 }
  0x1e   : > { %533 = vset.pattern.permute.xlu0 %v622_v4  ;;  %535 = vset.pattern.permute.xlu1 %v620_v1  ;;  %p559_p0 = pneg %p558_p13 }
  0x1f   : > { %266 = vperm.xlu0 %533, %v252_v0   ;;  %288 = vperm.xlu1 %535, %v284_v3  }
  0x20   : > { %537 = vset.pattern.permute.xlu2 %v621_v2  ;;  %p564_p5 = pnand %p563_p3, %p559_p0 }
  0x21   : > { %317 = vperm.xlu2 %537, %v284_v3  }
  0x27   : > { %538 = vset.pattern.permute.xlu1 %v623_v5  ;;  %539 = vset.pattern.permute.xlu0 %v623_v5 }
  0x28   : > { %331 = vperm.xlu1 %538, %v284_v3  }
  0x72   : > { %v304_v9 = vpop.permute.xlu2 %303 }
  0x73   : > { %v312_v43 = vmul.f32 %v310_v30, %v304_v9  ;;  %v313_v44 = vmul.f32 %v311_v31, %v304_v9 }
  0x7b   : > { %v318_v38 = vpop.permute.xlu2 %317 }
  0x7c   : > { %v326_v49 = vmul.f32 %v324_v36, %v318_v38  ;;  %v327_v50 = vmul.f32 %v325_v37, %v318_v38 }
  0x88   : > { %v256_v6 = vpop.permute.xlu0 %255  ;;  %v280_v7 = vpop.permute.xlu1 %279 }
  0x89   : > { %v263_v26 = vmul.f32 %v259_v14, %v256_v6  ;;  %v264_v27 = vmul.f32 %v260_v15, %v256_v6 }
  0x91   : > { %v267_v22 = vpop.permute.xlu0 %266  ;;  %v289_v23 = vpop.permute.xlu1 %288 }
  0x92   : > { %v274_v28 = vmul.f32 %v270_v16, %v267_v22  ;;  %v275_v29 = vmul.f32 %v271_v17, %v267_v22  ;;  %v298_v41 = vmul.f32 %v296_v24, %v289_v23  ;;  %v299_v42 = vmul.f32 %v297_v25, %v289_v23 }
  0x94   : > { %v276_v34 = vadd.f32 %v274_v28, %v263_v26  ;;  %v277_v35 = vadd.f32 %v275_v29, %v264_v27 }
  0x96   : > { %v282_v39 = vadd.f32 %v280_v7, %v276_v34  ;;  %v283_v40 = vadd.f32 %v280_v7, %v277_v35 }
  0x98   : > { %v300_v47 = vadd.f32 %v298_v41, %v282_v39  ;;  %v301_v48 = vadd.f32 %v299_v42, %v283_v40 }
  0x9a   : > { %v314_v51 = vadd.f32 %v312_v43, %v300_v47  ;;  %v315_v52 = vadd.f32 %v313_v44, %v301_v48  ;;  %v332_v53 = vpop.permute.xlu1 %331 }
  0x9b   : > { %v340_v54 = vmul.f32 %v338_v45, %v332_v53  ;;  %v341_v55 = vmul.f32 %v339_v46, %v332_v53 }
  0x9c   : > { %v328_v56 = vadd.f32 %v326_v49, %v314_v51  ;;  %v329_v57 = vadd.f32 %v327_v50, %v315_v52 }
  0x9e   : > { %v342_v58 = vadd.f32 %v340_v54, %v328_v56  ;;  %v343_v59 = vadd.f32 %v341_v55, %v329_v57 }
  0xa0   : > { %344 = vst [vmem:[%s231_s18] sm:$0xff] %v342_v58 }
  0xa1   : > { %345 = vst [vmem:[%s231_s18 + $0x8] sm:$0xff] %v343_v59 }
  0xa2   : > { %567 = shalt.err (!%p564_p5)
}
  0xa3   : > { %473 = dma.vmem_to_hbm [thread:$0]  (%p689_p4), %s363_s6, 256, %s365_s7, %s347_s8  }
  0xa4 PF: > { %p479_p6 = scmp.ge.s32.totalorder %s618_s20, 2  ;;  %s376_s22 = sand.u32 1, %s598_s15  }
  0xa5   : > { %s377_s24 = scalar_lea.sflag [#allocation3], %s376_s22 }
  0xa6   : > { %p476_p7 = pnand %p479_p6, %p696_p8 }
  0xa8   : > { %p477_p9 = pneg %p476_p7 }
  0xaa   : > { %593 = dma.done.wait (%p477_p9), %s377_s24, 256  }
  0xab   : > { %595 = vsyncadd (%p477_p9), %s377_s24, 4294967040  ;;  %s17_s20 = sadd.s32 1, %s618_s20   ;;  %s769_s15 = smov %s602_s16 }
  0xac   : > { %p14_p10 = scmp.ge.s32.totalorder %s17_s20, 4   ;;  %s770_s16 = smov %s606_s17 }
  0xad   : > { %s771_s17 = smov %s702_s28  ;;  %s772_s18 = smov %s614_s19 }
  0xae   : > { %s773_s19 = smov %s775_s23  ;;  %16 = sbr.rel (!%p14_p10) target bundleno = 4 (0x4), region = 75 }
  0xb3   :  { %383 = vsyncpa [#allocation3], 1 }
  0xb4   :  { %385 = vsyncpa [#allocation3 + $0x1], 1 }

</bundles_post_ra>
